<compile_context>
chip_gen: v6e
topology: v6e:2x2x1
jax: 0.10.0
libtpu: 0.0.40
codegen_flags: <defaults>
</compile_context>

<pallas_src>
import functools

import jax
import jax.numpy as jnp
from jax.experimental import pallas as pl
from jax.experimental.pallas import tpu as pltpu


# ------------------------------- config -------------------------------------
MODEL_INPUT_SIZE = 1   # "joint" model type -> input_size == 1
LAYER_SIZE = 32        # hidden size H (module default is 10; 32 is TPU-friendlier,
                       # semantics identical for this H)
NUM_LAYERS = 2         # number of LSTMCell applications (same cell reused, as in the module)
RESIDUAL = True

# TODO(synk): exact LeakyTanh definition is not in the provided source; using
# tanh(x) + 0.01*x (a leaky tanh that never fully saturates).
LEAK = 0.01


def _leaky_tanh(x):
    return jnp.tanh(x) + LEAK * x


# ------------------------------- kernel -------------------------------------
def _lstm_seq_kernel(
    # inputs
    x_ref, h0_ref, c0_ref,
    vx_ref,    # (4, D_in, H) layer-0 x->gate weights (input layer folded in)
    bx0_ref,   # (4, 1, H)    layer-0 gate biases (input-layer bias folded in)
    wh_ref,    # (4, H, H)    layer-0 h->gate weights
    wsum_ref,  # (4, H, H)    layer>=1 fused (Wx + Wh) gate weights
    bsum_ref,  # (4, 1, H)    layer>=1 gate biases
    w_out_ref, b_out_ref,
    # outputs
    out_ref,
    # scratch (persists across grid steps)
    h_sc, c_sc,
    *, num_layers: int, d_in: int, residual: bool, out_width: int, mxu_dtype,
):
    t = pl.program_id(0)

    # Initialize the carried hidden state from h0/c0 on the first timestep only.
    @pl.when(t == 0)
    def _():
        h_sc[...] = h0_ref[...].astype(jnp.float32)
        c_sc[...] = c0_ref[...].astype(jnp.float32)

    x_t = x_ref[0].astype(jnp.float32)        # (B, D_in)
    h = h_sc[...]                             # (B, H)
    c = c_sc[...]                             # (B, H)
    B = h.shape[0]

    def _sigmoid(v):
        # single EUP tanh per gate instead of exp + reciprocal
        return 0.5 * (jnp.tanh(0.5 * v) + 1.0)

    def _dot(a, w):
        return jnp.dot(a.astype(mxu_dtype), w.astype(mxu_dtype),
                       preferred_element_type=jnp.float32)

    def _x_contrib(k):
        # x @ vx_g : (B, D_in) @ (D_in, H).  D_in == 1 -> VPU broadcast multiply.
        if d_in == 1:
            return x_t * vx_ref[k]            # (B,1) * (1,H) -> (B,H)
        return _dot(x_t, vx_ref[k])

    # num_layers is a static Python int -> unrolled.  Same LSTMCell weights are
    # reused each application (matches the module); h feeds back as next input.
    for layer in range(num_layers):
        if layer == 0:
            pre = [_x_contrib(k) + _dot(h, wh_ref[k]) + bx0_ref[k]
                   for k in range(4)]
        else:
            # cell input == h  =>  h@Wx + h@Wh == h@(Wx+Wh); no concat needed.
            pre = [_dot(h, wsum_ref[k]) + bsum_ref[k] for k in range(4)]
        i_g = _sigmoid(pre[0])
        f_g = _sigmoid(pre[1])
        g_g = jnp.tanh(pre[2])
        o_g = _sigmoid(pre[3])
        c = f_g * c + i_g * g_g
        h = o_g * jnp.tanh(c)

    # output_layer: Linear(H -> 1) as VPU multiply + lane reduce (N=1 matmul avoided).
    out = jnp.sum(h * w_out_ref[...], axis=-1, keepdims=True) + b_out_ref[...]  # (B, 1)

    if residual:
        if d_in == 1:
            out = out + x_t                   # sum over a size-1 axis == x
        else:
            out = out + jnp.sum(x_t, axis=-1, keepdims=True)

    out = _leaky_tanh(out)

    # Carry state to next timestep.
    h_sc[...] = h
    c_sc[...] = c

    # Lane-dense packed output slab: [ h | c | out broadcast over remaining lanes ].
    out_ref[0] = jnp.concatenate(
        [h, c, jnp.broadcast_to(out, (B, out_width))], axis=-1
    ).astype(out_ref.dtype)


# ------------------------------- wrappers ------------------------------------
def _resident_spec(op):
    zeros = (0,) * op.ndim
    return pl.BlockSpec(op.shape, lambda t, _z=zeros: _z)


def lstm_neuron_sequence(x_seq, hidden, params, *,
                         num_layers=NUM_LAYERS, layer_size=LAYER_SIZE,
                         residual=RESIDUAL, mxu_dtype=jnp.float32):
    """Run T module-forward steps in ONE pallas_call (weights resident in VMEM,
    h/c carried in VMEM scratch across the grid).

    x_seq:  (T, B, D_in) float32
    hidden: (h0, c0), each (B, H) float32 (zeros == the module's `hidden=None`)
    returns (outputs (T, B, 1), (h_T (B, H), c_T (B, H)))
    """
    T, B, D_in = x_seq.shape
    H = layer_size
    h0, c0 = hidden

    slab = ((2 * H + 1 + 127) // 128) * 128    # lane-dense output width (128 for H=32)
    out_width = slab - 2 * H

    operands = (
        x_seq, h0, c0,
        params["vx"], params["bx0"], params["wh"], params["wsum"], params["bsum"],
        params["w_out"], params["b_out"],
    )

    # All parameter operands are full resident blocks (constant index map ->
    # DMA'd once, stay in VMEM); x is streamed one timestep at a time.
    in_specs = [pl.BlockSpec((1, B, D_in), lambda t: (t, 0, 0))]
    in_specs += [_resident_spec(op) for op in operands[1:]]

    out_shape = jax.ShapeDtypeStruct((T, B, slab), jnp.float32)
    out_specs = pl.BlockSpec((1, B, slab), lambda t: (t, 0, 0))

    kernel = functools.partial(
        _lstm_seq_kernel,
        num_layers=num_layers, d_in=D_in, residual=residual,
        out_width=out_width, mxu_dtype=mxu_dtype,
    )

    slab_out = pl.pallas_call(
        kernel,
        grid_spec=pltpu.PrefetchScalarGridSpec(
            num_scalar_prefetch=0,
            grid=(T,),
            in_specs=in_specs,
            out_specs=out_specs,
            scratch_shapes=[pltpu.VMEM((B, H), jnp.float32),
                            pltpu.VMEM((B, H), jnp.float32)],
        ),
        out_shape=out_shape,
        compiler_params=pltpu.CompilerParams(
            dimension_semantics=("arbitrary",)),   # timesteps carry state -> sequential
    )(*operands)

    outputs = slab_out[:, :, 2 * H:2 * H + 1]      # (T, B, 1)
    h_final = slab_out[T - 1, :, :H]               # (B, H)
    c_final = slab_out[T - 1, :, H:2 * H]          # (B, H)
    return outputs, (h_final, c_final)


def lstm_neuron_forward(x, hidden, params, *,
                        num_layers=NUM_LAYERS, layer_size=LAYER_SIZE,
                        residual=RESIDUAL, mxu_dtype=jnp.float32):
    """Module-faithful single-step forward (LSTMNeuron.forward): T == 1."""
    outs, (h, c) = lstm_neuron_sequence(
        x[None], hidden, params,
        num_layers=num_layers, layer_size=layer_size,
        residual=residual, mxu_dtype=mxu_dtype)
    return outs[0], (h, c)


# --------------------------- parameters --------------------------------------
def init_params(key, input_size=MODEL_INPUT_SIZE, layer_size=LAYER_SIZE):
    """PyTorch-layout parameters (uniform +-1/sqrt(fan_in) init)."""
    H = layer_size
    ks = jax.random.split(key, 8)

    def uni(k, shape, fan_in):
        bound = 1.0 / jnp.sqrt(jnp.float32(fan_in))
        return jax.random.uniform(k, shape, jnp.float32, -bound, bound)

    return {
        "w_in": uni(ks[0], (H, input_size), input_size),   # Linear(in, H).weight
        "b_in": uni(ks[1], (H,), input_size),
        "w_ih": uni(ks[2], (4 * H, H), H),                 # LSTMCell.weight_ih (i,f,g,o)
        "b_ih": uni(ks[3], (4 * H,), H),
        "w_hh": uni(ks[4], (4 * H, H), H),                 # LSTMCell.weight_hh
        "b_hh": uni(ks[5], (4 * H,), H),
        "w_out": uni(ks[6], (1, H), H),                    # Linear(H, 1).weight
        "b_out": uni(ks[7], (1,), H),
    }


def prepare_params(raw, layer_size=LAYER_SIZE):
    """Convert PyTorch-layout params to the kernel layout.

    Per gate g in (i, f, g, o):
      Wx_g = w_ih[g].T, Wh_g = w_hh[g].T, b_g = b_ih[g] + b_hh[g]
      layer 0:   gate = x @ (Win @ Wx_g) + h @ Wh_g + (bin @ Wx_g + b_g)
      layer >=1: gate = h @ (Wx_g + Wh_g) + b_g
    (input Linear folded into layer-0 gates; all algebraically identical to the module).
    """
    H = layer_size
    w_in = raw["w_in"].T                                   # (D_in, H)
    b_in = raw["b_in"].reshape(1, H)

    wx = jnp.stack([raw["w_ih"][k * H:(k + 1) * H, :].T for k in range(4)])  # (4, H, H)
    wh = jnp.stack([raw["w_hh"][k * H:(k + 1) * H, :].T for k in range(4)])  # (4, H, H)
    b_g = (raw["b_ih"] + raw["b_hh"]).reshape(4, 1, H)                        # (4, 1, H)

    vx = jnp.einsum("dh,khg->kdg", w_in, wx)               # (4, D_in, H)
    bx0 = jnp.einsum("h,khg->kg", b_in[0], wx)[:, None, :] + b_g   # (4, 1, H)
    wsum = wx + wh                                         # (4, H, H)

    return {
        "vx": vx, "bx0": bx0, "wh": wh, "wsum": wsum, "bsum": b_g,
        "w_out": raw["w_out"],                             # (1, H) — used as VPU row
        "b_out": raw["b_out"].reshape(1, 1),
    }


# --------------------------- pure-JAX reference -------------------------------
def reference_step(x, hidden, raw, *, num_layers=NUM_LAYERS,
                   layer_size=LAYER_SIZE, residual=RESIDUAL):
    """Pure-JAX transcription of LSTMNeuron.forward using PyTorch-layout weights."""
    H = layer_size
    h, c = hidden
    cur = x @ raw["w_in"].T + raw["b_in"]
    for _ in range(num_layers):
        gates = (cur @ raw["w_ih"].T + raw["b_ih"]
                 + h @ raw["w_hh"].T + raw["b_hh"])
        i_g = jax.nn.sigmoid(gates[:, 0 * H:1 * H])
        f_g = jax.nn.sigmoid(gates[:, 1 * H:2 * H])
        g_g = jnp.tanh(gates[:, 2 * H:3 * H])
        o_g = jax.nn.sigmoid(gates[:, 3 * H:4 * H])
        c = f_g * c + i_g * g_g
        h = o_g * jnp.tanh(c)
        cur = h
    out = h @ raw["w_out"].T + raw["b_out"]
    if residual:
        out = out + jnp.sum(x, axis=1, keepdims=True)
    return _leaky_tanh(out), (h, c)


# ---------------------------------- main --------------------------------------
if __name__ == "__main__":
    key = jax.random.PRNGKey(0)
    k_params, k_x, k_seq = jax.random.split(key, 3)

    B, H, D_IN, T = 8, LAYER_SIZE, MODEL_INPUT_SIZE, 8

    raw = init_params(k_params, D_IN, H)
    params = prepare_params(raw, H)

    h0 = jnp.zeros((B, H), jnp.float32)   # module's `hidden=None` semantics
    c0 = jnp.zeros((B, H), jnp.float32)

    # ---- single step (exact module forward) ----
    x = jax.random.normal(k_x, (B, D_IN), jnp.float32)
    out, (h, c) = lstm_neuron_forward(x, (h0, c0), params)
    out = jax.block_until_ready(out)

    ref_out, (ref_h, ref_c) = reference_step(x, (h0, c0), raw)
    assert jnp.allclose(out, ref_out, atol=1e-4, rtol=1e-4)
    assert jnp.allclose(h, ref_h, atol=1e-4, rtol=1e-4)
    assert jnp.allclose(c, ref_c, atol=1e-4, rtol=1e-4)

    # ---- T steps fused into one pallas_call (sequence loop inside kernel) ----
    x_seq = jax.random.normal(k_seq, (T, B, D_IN), jnp.float32)
    outs, (hT, cT) = lstm_neuron_sequence(x_seq, (h0, c0), params)
    outs = jax.block_until_ready(outs)

    rh, rc = h0, c0
    ref_outs = []
    for t in range(T):
        ro, (rh, rc) = reference_step(x_seq[t], (rh, rc), raw)
        ref_outs.append(ro)
    ref_outs = jnp.stack(ref_outs)

    assert jnp.allclose(outs, ref_outs, atol=1e-4, rtol=1e-4)
    assert jnp.allclose(hT, rh, atol=1e-4, rtol=1e-4)
    assert jnp.allclose(cT, rc, atol=1e-4, rtol=1e-4)

    print("KERNEL_OK")
</pallas_src>

<mosaic_0001>
module attributes {stable_mosaic.version = 11 : i64} {
  func.func @_lstm_seq_kernel(%arg0: i32, %arg1: memref<1x8x1xf32, #tpu.memory_space<vmem>>, %arg2: memref<8x32xf32, #tpu.memory_space<vmem>>, %arg3: memref<8x32xf32, #tpu.memory_space<vmem>>, %arg4: memref<4x1x32xf32, #tpu.memory_space<vmem>>, %arg5: memref<4x1x32xf32, #tpu.memory_space<vmem>>, %arg6: memref<4x32x32xf32, #tpu.memory_space<vmem>>, %arg7: memref<4x32x32xf32, #tpu.memory_space<vmem>>, %arg8: memref<4x1x32xf32, #tpu.memory_space<vmem>>, %arg9: memref<1x32xf32, #tpu.memory_space<vmem>>, %arg10: memref<1x1xf32, #tpu.memory_space<vmem>>, %arg11: memref<1x8x128xf32, #tpu.memory_space<vmem>>, %arg12: memref<8x32xf32, #tpu.memory_space<vmem>>, %arg13: memref<8x32xf32, #tpu.memory_space<vmem>>) attributes {dimension_semantics = [#tpu.dimension_semantics<arbitrary>], iteration_bounds = array<i64: 1>, scalar_prefetch = 0 : i64, scratch_operands = 2 : i64, tpu.core_type = #tpu.core_type<tc>, window_params = [{transform_indices = @transform_0, window_bounds = array<i64: 1, 8, 1>}, {pipeline_mode = #tpu.pipeline_mode<synchronous>, transform_indices = @transform_1, window_bounds = array<i64: 8, 32>}, {pipeline_mode = #tpu.pipeline_mode<synchronous>, transform_indices = @transform_2, window_bounds = array<i64: 8, 32>}, {pipeline_mode = #tpu.pipeline_mode<synchronous>, transform_indices = @transform_3, window_bounds = array<i64: 4, 1, 32>}, {pipeline_mode = #tpu.pipeline_mode<synchronous>, transform_indices = @transform_4, window_bounds = array<i64: 4, 1, 32>}, {pipeline_mode = #tpu.pipeline_mode<synchronous>, transform_indices = @transform_5, window_bounds = array<i64: 4, 32, 32>}, {pipeline_mode = #tpu.pipeline_mode<synchronous>, transform_indices = @transform_6, window_bounds = array<i64: 4, 32, 32>}, {pipeline_mode = #tpu.pipeline_mode<synchronous>, transform_indices = @transform_7, window_bounds = array<i64: 4, 1, 32>}, {pipeline_mode = #tpu.pipeline_mode<synchronous>, transform_indices = @transform_8, window_bounds = array<i64: 1, 32>}, {pipeline_mode = #tpu.pipeline_mode<synchronous>, transform_indices = @transform_9, window_bounds = array<i64: 1, 1>}, {transform_indices = @transform_10, window_bounds = array<i64: 1, 8, 128>}]} {
    %c0_i32 = arith.constant 0 : i32
    %0 = arith.cmpi eq, %arg0, %c0_i32 : i32
    %1 = arith.extui %0 : i1 to i32
    %c0_i32_0 = arith.constant 0 : i32
    %2 = arith.cmpi ne, %1, %c0_i32_0 : i32
    scf.if %2 {
      %c0_102 = arith.constant 0 : index
      %c0_103 = arith.constant 0 : index
      %162 = vector.load %arg2[%c0_102, %c0_103] : memref<8x32xf32, #tpu.memory_space<vmem>>, vector<8x32xf32>
      %c0_104 = arith.constant 0 : index
      %c0_105 = arith.constant 0 : index
      %163 = vector.load %arg12[%c0_104, %c0_105] : memref<8x32xf32, #tpu.memory_space<vmem>>, vector<8x32xf32>
      tpu.vector_store %arg12[%c0_104, %c0_105], %162 {strides = array<i32>} : memref<8x32xf32, #tpu.memory_space<vmem>>, vector<8x32xf32>,
      %c0_106 = arith.constant 0 : index
      %c0_107 = arith.constant 0 : index
      %164 = vector.load %arg3[%c0_106, %c0_107] : memref<8x32xf32, #tpu.memory_space<vmem>>, vector<8x32xf32>
      %c0_108 = arith.constant 0 : index
      %c0_109 = arith.constant 0 : index
      %165 = vector.load %arg13[%c0_108, %c0_109] : memref<8x32xf32, #tpu.memory_space<vmem>>, vector<8x32xf32>
      tpu.vector_store %arg13[%c0_108, %c0_109], %164 {strides = array<i32>} : memref<8x32xf32, #tpu.memory_space<vmem>>, vector<8x32xf32>,
    } else {
    }
    %c0 = arith.constant 0 : index
    %c0_1 = arith.constant 0 : index
    %c0_2 = arith.constant 0 : index
    %3 = vector.load %arg1[%c0, %c0_1, %c0_2] : memref<1x8x1xf32, #tpu.memory_space<vmem>>, vector<1x8x1xf32>
    %4 = vector.shape_cast %3 : vector<1x8x1xf32> to vector<8x1xf32>
    %c0_3 = arith.constant 0 : index
    %c0_4 = arith.constant 0 : index
    %5 = vector.load %arg12[%c0_3, %c0_4] : memref<8x32xf32, #tpu.memory_space<vmem>>, vector<8x32xf32>
    %c0_5 = arith.constant 0 : index
    %c0_6 = arith.constant 0 : index
    %6 = vector.load %arg13[%c0_5, %c0_6] : memref<8x32xf32, #tpu.memory_space<vmem>>, vector<8x32xf32>
    %c0_7 = arith.constant 0 : index
    %c0_8 = arith.constant 0 : index
    %c0_9 = arith.constant 0 : index
    %7 = vector.load %arg4[%c0_7, %c0_8, %c0_9] : memref<4x1x32xf32, #tpu.memory_space<vmem>>, vector<1x1x32xf32>
    %8 = vector.shape_cast %7 : vector<1x1x32xf32> to vector<1x32xf32>
    %9 = vector.broadcast %4 : vector<8x1xf32> to vector<8x32xf32>
    %10 = vector.broadcast %8 : vector<1x32xf32> to vector<8x32xf32>
    %11 = arith.mulf %9, %10 : vector<8x32xf32>
    %c0_10 = arith.constant 0 : index
    %c0_11 = arith.constant 0 : index
    %c0_12 = arith.constant 0 : index
    %12 = vector.load %arg6[%c0_10, %c0_11, %c0_12] : memref<4x32x32xf32, #tpu.memory_space<vmem>>, vector<1x32x32xf32>
    %13 = vector.shape_cast %12 : vector<1x32x32xf32> to vector<32x32xf32>
    %cst = arith.constant dense<0.000000e+00> : vector<8x32xf32>
    %14 = tpu.matmul %5, %13, %cst {dimension_numbers = #tpu.dot_dimension_numbers<[1], [0], [0], [1], [0, 0, 1, 1], [], []>} : vector<8x32xf32>, vector<32x32xf32>, vector<8x32xf32> -> vector<8x32xf32>
    %15 = arith.addf %11, %14 : vector<8x32xf32>
    %c0_13 = arith.constant 0 : index
    %c0_14 = arith.constant 0 : index
    %c0_15 = arith.constant 0 : index
    %16 = vector.load %arg5[%c0_13, %c0_14, %c0_15] : memref<4x1x32xf32, #tpu.memory_space<vmem>>, vector<1x1x32xf32>
    %17 = vector.shape_cast %16 : vector<1x1x32xf32> to vector<1x32xf32>
    %18 = vector.broadcast %17 : vector<1x32xf32> to vector<8x32xf32>
    %19 = arith.addf %15, %18 : vector<8x32xf32>
    %c1 = arith.constant 1 : index
    %c0_16 = arith.constant 0 : index
    %c0_17 = arith.constant 0 : index
    %20 = vector.load %arg4[%c1, %c0_16, %c0_17] : memref<4x1x32xf32, #tpu.memory_space<vmem>>, vector<1x1x32xf32>
    %21 = vector.shape_cast %20 : vector<1x1x32xf32> to vector<1x32xf32>
    %22 = vector.broadcast %4 : vector<8x1xf32> to vector<8x32xf32>
    %23 = vector.broadcast %21 : vector<1x32xf32> to vector<8x32xf32>
    %24 = arith.mulf %22, %23 : vector<8x32xf32>
    %c1_18 = arith.constant 1 : index
    %c0_19 = arith.constant 0 : index
    %c0_20 = arith.constant 0 : index
    %25 = vector.load %arg6[%c1_18, %c0_19, %c0_20] : memref<4x32x32xf32, #tpu.memory_space<vmem>>, vector<1x32x32xf32>
    %26 = vector.shape_cast %25 : vector<1x32x32xf32> to vector<32x32xf32>
    %cst_21 = arith.constant dense<0.000000e+00> : vector<8x32xf32>
    %27 = tpu.matmul %5, %26, %cst_21 {dimension_numbers = #tpu.dot_dimension_numbers<[1], [0], [0], [1], [0, 0, 1, 1], [], []>} : vector<8x32xf32>, vector<32x32xf32>, vector<8x32xf32> -> vector<8x32xf32>
    %28 = arith.addf %24, %27 : vector<8x32xf32>
    %c1_22 = arith.constant 1 : index
    %c0_23 = arith.constant 0 : index
    %c0_24 = arith.constant 0 : index
    %29 = vector.load %arg5[%c1_22, %c0_23, %c0_24] : memref<4x1x32xf32, #tpu.memory_space<vmem>>, vector<1x1x32xf32>
    %30 = vector.shape_cast %29 : vector<1x1x32xf32> to vector<1x32xf32>
    %31 = vector.broadcast %30 : vector<1x32xf32> to vector<8x32xf32>
    %32 = arith.addf %28, %31 : vector<8x32xf32>
    %c2 = arith.constant 2 : index
    %c0_25 = arith.constant 0 : index
    %c0_26 = arith.constant 0 : index
    %33 = vector.load %arg4[%c2, %c0_25, %c0_26] : memref<4x1x32xf32, #tpu.memory_space<vmem>>, vector<1x1x32xf32>
    %34 = vector.shape_cast %33 : vector<1x1x32xf32> to vector<1x32xf32>
    %35 = vector.broadcast %4 : vector<8x1xf32> to vector<8x32xf32>
    %36 = vector.broadcast %34 : vector<1x32xf32> to vector<8x32xf32>
    %37 = arith.mulf %35, %36 : vector<8x32xf32>
    %c2_27 = arith.constant 2 : index
    %c0_28 = arith.constant 0 : index
    %c0_29 = arith.constant 0 : index
    %38 = vector.load %arg6[%c2_27, %c0_28, %c0_29] : memref<4x32x32xf32, #tpu.memory_space<vmem>>, vector<1x32x32xf32>
    %39 = vector.shape_cast %38 : vector<1x32x32xf32> to vector<32x32xf32>
    %cst_30 = arith.constant dense<0.000000e+00> : vector<8x32xf32>
    %40 = tpu.matmul %5, %39, %cst_30 {dimension_numbers = #tpu.dot_dimension_numbers<[1], [0], [0], [1], [0, 0, 1, 1], [], []>} : vector<8x32xf32>, vector<32x32xf32>, vector<8x32xf32> -> vector<8x32xf32>
    %41 = arith.addf %37, %40 : vector<8x32xf32>
    %c2_31 = arith.constant 2 : index
    %c0_32 = arith.constant 0 : index
    %c0_33 = arith.constant 0 : index
    %42 = vector.load %arg5[%c2_31, %c0_32, %c0_33] : memref<4x1x32xf32, #tpu.memory_space<vmem>>, vector<1x1x32xf32>
    %43 = vector.shape_cast %42 : vector<1x1x32xf32> to vector<1x32xf32>
    %44 = vector.broadcast %43 : vector<1x32xf32> to vector<8x32xf32>
    %45 = arith.addf %41, %44 : vector<8x32xf32>
    %c3 = arith.constant 3 : index
    %c0_34 = arith.constant 0 : index
    %c0_35 = arith.constant 0 : index
    %46 = vector.load %arg4[%c3, %c0_34, %c0_35] : memref<4x1x32xf32, #tpu.memory_space<vmem>>, vector<1x1x32xf32>
    %47 = vector.shape_cast %46 : vector<1x1x32xf32> to vector<1x32xf32>
    %48 = vector.broadcast %4 : vector<8x1xf32> to vector<8x32xf32>
    %49 = vector.broadcast %47 : vector<1x32xf32> to vector<8x32xf32>
    %50 = arith.mulf %48, %49 : vector<8x32xf32>
    %c3_36 = arith.constant 3 : index
    %c0_37 = arith.constant 0 : index
    %c0_38 = arith.constant 0 : index
    %51 = vector.load %arg6[%c3_36, %c0_37, %c0_38] : memref<4x32x32xf32, #tpu.memory_space<vmem>>, vector<1x32x32xf32>
    %52 = vector.shape_cast %51 : vector<1x32x32xf32> to vector<32x32xf32>
    %cst_39 = arith.constant dense<0.000000e+00> : vector<8x32xf32>
    %53 = tpu.matmul %5, %52, %cst_39 {dimension_numbers = #tpu.dot_dimension_numbers<[1], [0], [0], [1], [0, 0, 1, 1], [], []>} : vector<8x32xf32>, vector<32x32xf32>, vector<8x32xf32> -> vector<8x32xf32>
    %54 = arith.addf %50, %53 : vector<8x32xf32>
    %c3_40 = arith.constant 3 : index
    %c0_41 = arith.constant 0 : index
    %c0_42 = arith.constant 0 : index
    %55 = vector.load %arg5[%c3_40, %c0_41, %c0_42] : memref<4x1x32xf32, #tpu.memory_space<vmem>>, vector<1x1x32xf32>
    %56 = vector.shape_cast %55 : vector<1x1x32xf32> to vector<1x32xf32>
    %57 = vector.broadcast %56 : vector<1x32xf32> to vector<8x32xf32>
    %58 = arith.addf %54, %57 : vector<8x32xf32>
    %cst_43 = arith.constant 5.000000e-01 : f32
    %59 = vector.broadcast %cst_43 : f32 to vector<8x32xf32>
    %60 = arith.mulf %59, %19 : vector<8x32xf32>
    %61 = math.tanh %60 : vector<8x32xf32>
    %cst_44 = arith.constant 1.000000e+00 : f32
    %62 = vector.broadcast %cst_44 : f32 to vector<8x32xf32>
    %63 = arith.addf %61, %62 : vector<8x32xf32>
    %cst_45 = arith.constant 5.000000e-01 : f32
    %64 = vector.broadcast %cst_45 : f32 to vector<8x32xf32>
    %65 = arith.mulf %64, %63 : vector<8x32xf32>
    %cst_46 = arith.constant 5.000000e-01 : f32
    %66 = vector.broadcast %cst_46 : f32 to vector<8x32xf32>
    %67 = arith.mulf %66, %32 : vector<8x32xf32>
    %68 = math.tanh %67 : vector<8x32xf32>
    %cst_47 = arith.constant 1.000000e+00 : f32
    %69 = vector.broadcast %cst_47 : f32 to vector<8x32xf32>
    %70 = arith.addf %68, %69 : vector<8x32xf32>
    %cst_48 = arith.constant 5.000000e-01 : f32
    %71 = vector.broadcast %cst_48 : f32 to vector<8x32xf32>
    %72 = arith.mulf %71, %70 : vector<8x32xf32>
    %73 = math.tanh %45 : vector<8x32xf32>
    %cst_49 = arith.constant 5.000000e-01 : f32
    %74 = vector.broadcast %cst_49 : f32 to vector<8x32xf32>
    %75 = arith.mulf %74, %58 : vector<8x32xf32>
    %76 = math.tanh %75 : vector<8x32xf32>
    %cst_50 = arith.constant 1.000000e+00 : f32
    %77 = vector.broadcast %cst_50 : f32 to vector<8x32xf32>
    %78 = arith.addf %76, %77 : vector<8x32xf32>
    %cst_51 = arith.constant 5.000000e-01 : f32
    %79 = vector.broadcast %cst_51 : f32 to vector<8x32xf32>
    %80 = arith.mulf %79, %78 : vector<8x32xf32>
    %81 = arith.mulf %72, %6 : vector<8x32xf32>
    %82 = arith.mulf %65, %73 : vector<8x32xf32>
    %83 = arith.addf %81, %82 : vector<8x32xf32>
    %84 = math.tanh %83 : vector<8x32xf32>
    %85 = arith.mulf %80, %84 : vector<8x32xf32>
    %c0_52 = arith.constant 0 : index
    %c0_53 = arith.constant 0 : index
    %c0_54 = arith.constant 0 : index
    %86 = vector.load %arg7[%c0_52, %c0_53, %c0_54] : memref<4x32x32xf32, #tpu.memory_space<vmem>>, vector<1x32x32xf32>
    %87 = vector.shape_cast %86 : vector<1x32x32xf32> to vector<32x32xf32>
    %cst_55 = arith.constant dense<0.000000e+00> : vector<8x32xf32>
    %88 = tpu.matmul %85, %87, %cst_55 {dimension_numbers = #tpu.dot_dimension_numbers<[1], [0], [0], [1], [0, 0, 1, 1], [], []>} : vector<8x32xf32>, vector<32x32xf32>, vector<8x32xf32> -> vector<8x32xf32>
    %c0_56 = arith.constant 0 : index
    %c0_57 = arith.constant 0 : index
    %c0_58 = arith.constant 0 : index
    %89 = vector.load %arg8[%c0_56, %c0_57, %c0_58] : memref<4x1x32xf32, #tpu.memory_space<vmem>>, vector<1x1x32xf32>
    %90 = vector.shape_cast %89 : vector<1x1x32xf32> to vector<1x32xf32>
    %91 = vector.broadcast %90 : vector<1x32xf32> to vector<8x32xf32>
    %92 = arith.addf %88, %91 : vector<8x32xf32>
    %c1_59 = arith.constant 1 : index
    %c0_60 = arith.constant 0 : index
    %c0_61 = arith.constant 0 : index
    %93 = vector.load %arg7[%c1_59, %c0_60, %c0_61] : memref<4x32x32xf32, #tpu.memory_space<vmem>>, vector<1x32x32xf32>
    %94 = vector.shape_cast %93 : vector<1x32x32xf32> to vector<32x32xf32>
    %cst_62 = arith.constant dense<0.000000e+00> : vector<8x32xf32>
    %95 = tpu.matmul %85, %94, %cst_62 {dimension_numbers = #tpu.dot_dimension_numbers<[1], [0], [0], [1], [0, 0, 1, 1], [], []>} : vector<8x32xf32>, vector<32x32xf32>, vector<8x32xf32> -> vector<8x32xf32>
    %c1_63 = arith.constant 1 : index
    %c0_64 = arith.constant 0 : index
    %c0_65 = arith.constant 0 : index
    %96 = vector.load %arg8[%c1_63, %c0_64, %c0_65] : memref<4x1x32xf32, #tpu.memory_space<vmem>>, vector<1x1x32xf32>
    %97 = vector.shape_cast %96 : vector<1x1x32xf32> to vector<1x32xf32>
    %98 = vector.broadcast %97 : vector<1x32xf32> to vector<8x32xf32>
    %99 = arith.addf %95, %98 : vector<8x32xf32>
    %c2_66 = arith.constant 2 : index
    %c0_67 = arith.constant 0 : index
    %c0_68 = arith.constant 0 : index
    %100 = vector.load %arg7[%c2_66, %c0_67, %c0_68] : memref<4x32x32xf32, #tpu.memory_space<vmem>>, vector<1x32x32xf32>
    %101 = vector.shape_cast %100 : vector<1x32x32xf32> to vector<32x32xf32>
    %cst_69 = arith.constant dense<0.000000e+00> : vector<8x32xf32>
    %102 = tpu.matmul %85, %101, %cst_69 {dimension_numbers = #tpu.dot_dimension_numbers<[1], [0], [0], [1], [0, 0, 1, 1], [], []>} : vector<8x32xf32>, vector<32x32xf32>, vector<8x32xf32> -> vector<8x32xf32>
    %c2_70 = arith.constant 2 : index
    %c0_71 = arith.constant 0 : index
    %c0_72 = arith.constant 0 : index
    %103 = vector.load %arg8[%c2_70, %c0_71, %c0_72] : memref<4x1x32xf32, #tpu.memory_space<vmem>>, vector<1x1x32xf32>
    %104 = vector.shape_cast %103 : vector<1x1x32xf32> to vector<1x32xf32>
    %105 = vector.broadcast %104 : vector<1x32xf32> to vector<8x32xf32>
    %106 = arith.addf %102, %105 : vector<8x32xf32>
    %c3_73 = arith.constant 3 : index
    %c0_74 = arith.constant 0 : index
    %c0_75 = arith.constant 0 : index
    %107 = vector.load %arg7[%c3_73, %c0_74, %c0_75] : memref<4x32x32xf32, #tpu.memory_space<vmem>>, vector<1x32x32xf32>
    %108 = vector.shape_cast %107 : vector<1x32x32xf32> to vector<32x32xf32>
    %cst_76 = arith.constant dense<0.000000e+00> : vector<8x32xf32>
    %109 = tpu.matmul %85, %108, %cst_76 {dimension_numbers = #tpu.dot_dimension_numbers<[1], [0], [0], [1], [0, 0, 1, 1], [], []>} : vector<8x32xf32>, vector<32x32xf32>, vector<8x32xf32> -> vector<8x32xf32>
    %c3_77 = arith.constant 3 : index
    %c0_78 = arith.constant 0 : index
    %c0_79 = arith.constant 0 : index
    %110 = vector.load %arg8[%c3_77, %c0_78, %c0_79] : memref<4x1x32xf32, #tpu.memory_space<vmem>>, vector<1x1x32xf32>
    %111 = vector.shape_cast %110 : vector<1x1x32xf32> to vector<1x32xf32>
    %112 = vector.broadcast %111 : vector<1x32xf32> to vector<8x32xf32>
    %113 = arith.addf %109, %112 : vector<8x32xf32>
    %cst_80 = arith.constant 5.000000e-01 : f32
    %114 = vector.broadcast %cst_80 : f32 to vector<8x32xf32>
    %115 = arith.mulf %114, %92 : vector<8x32xf32>
    %116 = math.tanh %115 : vector<8x32xf32>
    %cst_81 = arith.constant 1.000000e+00 : f32
    %117 = vector.broadcast %cst_81 : f32 to vector<8x32xf32>
    %118 = arith.addf %116, %117 : vector<8x32xf32>
    %cst_82 = arith.constant 5.000000e-01 : f32
    %119 = vector.broadcast %cst_82 : f32 to vector<8x32xf32>
    %120 = arith.mulf %119, %118 : vector<8x32xf32>
    %cst_83 = arith.constant 5.000000e-01 : f32
    %121 = vector.broadcast %cst_83 : f32 to vector<8x32xf32>
    %122 = arith.mulf %121, %99 : vector<8x32xf32>
    %123 = math.tanh %122 : vector<8x32xf32>
    %cst_84 = arith.constant 1.000000e+00 : f32
    %124 = vector.broadcast %cst_84 : f32 to vector<8x32xf32>
    %125 = arith.addf %123, %124 : vector<8x32xf32>
    %cst_85 = arith.constant 5.000000e-01 : f32
    %126 = vector.broadcast %cst_85 : f32 to vector<8x32xf32>
    %127 = arith.mulf %126, %125 : vector<8x32xf32>
    %128 = math.tanh %106 : vector<8x32xf32>
    %cst_86 = arith.constant 5.000000e-01 : f32
    %129 = vector.broadcast %cst_86 : f32 to vector<8x32xf32>
    %130 = arith.mulf %129, %113 : vector<8x32xf32>
    %131 = math.tanh %130 : vector<8x32xf32>
    %cst_87 = arith.constant 1.000000e+00 : f32
    %132 = vector.broadcast %cst_87 : f32 to vector<8x32xf32>
    %133 = arith.addf %131, %132 : vector<8x32xf32>
    %cst_88 = arith.constant 5.000000e-01 : f32
    %134 = vector.broadcast %cst_88 : f32 to vector<8x32xf32>
    %135 = arith.mulf %134, %133 : vector<8x32xf32>
    %136 = arith.mulf %127, %83 : vector<8x32xf32>
    %137 = arith.mulf %120, %128 : vector<8x32xf32>
    %138 = arith.addf %136, %137 : vector<8x32xf32>
    %139 = math.tanh %138 : vector<8x32xf32>
    %140 = arith.mulf %135, %139 : vector<8x32xf32>
    %c0_89 = arith.constant 0 : index
    %c0_90 = arith.constant 0 : index
    %141 = vector.load %arg9[%c0_89, %c0_90] : memref<1x32xf32, #tpu.memory_space<vmem>>, vector<1x32xf32>
    %142 = vector.broadcast %141 : vector<1x32xf32> to vector<8x32xf32>
    %143 = arith.mulf %140, %142 : vector<8x32xf32>
    %cst_91 = arith.constant dense<0.000000e+00> : vector<8xf32>
    %144 = vector.multi_reduction <add>, %143, %cst_91 [1] : vector<8x32xf32> to vector<8xf32>
    %145 = vector.shape_cast %144 : vector<8xf32> to vector<8x1xf32>
    %c0_92 = arith.constant 0 : index
    %c0_93 = arith.constant 0 : index
    %146 = vector.load %arg10[%c0_92, %c0_93] : memref<1x1xf32, #tpu.memory_space<vmem>>, vector<1x1xf32>
    %147 = vector.broadcast %146 : vector<1x1xf32> to vector<8x1xf32>
    %148 = arith.addf %145, %147 : vector<8x1xf32>
    %149 = arith.addf %148, %4 : vector<8x1xf32>
    %150 = math.tanh %149 : vector<8x1xf32>
    %cst_94 = arith.constant 0.00999999977 : f32
    %151 = vector.broadcast %cst_94 : f32 to vector<8x1xf32>
    %152 = arith.mulf %151, %149 : vector<8x1xf32>
    %153 = arith.addf %150, %152 : vector<8x1xf32>
    %c0_95 = arith.constant 0 : index
    %c0_96 = arith.constant 0 : index
    %154 = vector.load %arg12[%c0_95, %c0_96] : memref<8x32xf32, #tpu.memory_space<vmem>>, vector<8x32xf32>
    tpu.vector_store %arg12[%c0_95, %c0_96], %140 {strides = array<i32>} : memref<8x32xf32, #tpu.memory_space<vmem>>, vector<8x32xf32>,
    %c0_97 = arith.constant 0 : index
    %c0_98 = arith.constant 0 : index
    %155 = vector.load %arg13[%c0_97, %c0_98] : memref<8x32xf32, #tpu.memory_space<vmem>>, vector<8x32xf32>
    tpu.vector_store %arg13[%c0_97, %c0_98], %138 {strides = array<i32>} : memref<8x32xf32, #tpu.memory_space<vmem>>, vector<8x32xf32>,
    %156 = vector.shape_cast %153 : vector<8x1xf32> to vector<8x1xf32>
    %157 = vector.broadcast %156 : vector<8x1xf32> to vector<8x64xf32>
    %158 = tpu.concatenate %140, %138, %157 in 1 : vector<8x32xf32>, vector<8x32xf32>, vector<8x64xf32> -> vector<8x128xf32>
    %c0_99 = arith.constant 0 : index
    %c0_100 = arith.constant 0 : index
    %c0_101 = arith.constant 0 : index
    %159 = vector.load %arg11[%c0_99, %c0_100, %c0_101] : memref<1x8x128xf32, #tpu.memory_space<vmem>>, vector<1x8x128xf32>
    %160 = vector.shape_cast %159 : vector<1x8x128xf32> to vector<8x128xf32>
    %161 = vector.shape_cast %158 : vector<8x128xf32> to vector<1x8x128xf32>
    tpu.vector_store %arg11[%c0_99, %c0_100, %c0_101], %161 {strides = array<i32>} : memref<1x8x128xf32, #tpu.memory_space<vmem>>, vector<1x8x128xf32>,
    return
  }
  func.func @transform_0(%arg0: i32) -> (i32, i32, i32) {
    %c0_i32 = arith.constant 0 : i32
    %c0_i32_0 = arith.constant 0 : i32
    %c0_i32_1 = arith.constant 0 : i32
    return %arg0, %c0_i32, %c0_i32_0 : i32, i32, i32
  }
  func.func @transform_1(%arg0: i32) -> (i32, i32) {
    %c0_i32 = arith.constant 0 : i32
    %c0_i32_0 = arith.constant 0 : i32
    %c0_i32_1 = arith.constant 0 : i32
    return %c0_i32, %c0_i32_0 : i32, i32
  }
  func.func @transform_2(%arg0: i32) -> (i32, i32) {
    %c0_i32 = arith.constant 0 : i32
    %c0_i32_0 = arith.constant 0 : i32
    %c0_i32_1 = arith.constant 0 : i32
    return %c0_i32, %c0_i32_0 : i32, i32
  }
  func.func @transform_3(%arg0: i32) -> (i32, i32, i32) {
    %c0_i32 = arith.constant 0 : i32
    %c0_i32_0 = arith.constant 0 : i32
    %c0_i32_1 = arith.constant 0 : i32
    %c0_i32_2 = arith.constant 0 : i32
    return %c0_i32, %c0_i32_0, %c0_i32_1 : i32, i32, i32
  }
  func.func @transform_4(%arg0: i32) -> (i32, i32, i32) {
    %c0_i32 = arith.constant 0 : i32
    %c0_i32_0 = arith.constant 0 : i32
    %c0_i32_1 = arith.constant 0 : i32
    %c0_i32_2 = arith.constant 0 : i32
    return %c0_i32, %c0_i32_0, %c0_i32_1 : i32, i32, i32
  }
  func.func @transform_5(%arg0: i32) -> (i32, i32, i32) {
    %c0_i32 = arith.constant 0 : i32
    %c0_i32_0 = arith.constant 0 : i32
    %c0_i32_1 = arith.constant 0 : i32
    %c0_i32_2 = arith.constant 0 : i32
    return %c0_i32, %c0_i32_0, %c0_i32_1 : i32, i32, i32
  }
  func.func @transform_6(%arg0: i32) -> (i32, i32, i32) {
    %c0_i32 = arith.constant 0 : i32
    %c0_i32_0 = arith.constant 0 : i32
    %c0_i32_1 = arith.constant 0 : i32
    %c0_i32_2 = arith.constant 0 : i32
    return %c0_i32, %c0_i32_0, %c0_i32_1 : i32, i32, i32
  }
  func.func @transform_7(%arg0: i32) -> (i32, i32, i32) {
    %c0_i32 = arith.constant 0 : i32
    %c0_i32_0 = arith.constant 0 : i32
    %c0_i32_1 = arith.constant 0 : i32
    %c0_i32_2 = arith.constant 0 : i32
    return %c0_i32, %c0_i32_0, %c0_i32_1 : i32, i32, i32
  }
  func.func @transform_8(%arg0: i32) -> (i32, i32) {
    %c0_i32 = arith.constant 0 : i32
    %c0_i32_0 = arith.constant 0 : i32
    %c0_i32_1 = arith.constant 0 : i32
    return %c0_i32, %c0_i32_0 : i32, i32
  }
  func.func @transform_9(%arg0: i32) -> (i32, i32) {
    %c0_i32 = arith.constant 0 : i32
    %c0_i32_0 = arith.constant 0 : i32
    %c0_i32_1 = arith.constant 0 : i32
    return %c0_i32, %c0_i32_0 : i32, i32
  }
  func.func @transform_10(%arg0: i32) -> (i32, i32, i32) {
    %c0_i32 = arith.constant 0 : i32
    %c0_i32_0 = arith.constant 0 : i32
    %c0_i32_1 = arith.constant 0 : i32
    return %arg0, %c0_i32, %c0_i32_0 : i32, i32, i32
  }
}

</mosaic_0001>

<bundles_post_ra>
// kernel: tpu_custom_call.1
= control target key start
LH: loop header
LB: loop body
LE: loop exit
PB: predicated region body
PF: predicated region fallthrough
CT: control target
= control target key end

     0   :  { %s1368_s0 = inlined_call_operand.vmem [shape: f32[1,8,1], index: 0, kind: input, shape index: {}]   ;;  %s1369_s1 = inlined_call_operand.vmem [shape: f32[8,32], index: 1, kind: input, shape index: {}]   ;;  %s1370_s2 = inlined_call_operand.hbm [shape: f32[8,32], index: 2, kind: input, shape index: {}]   ;;  %s1371_s3 = inlined_call_operand.vmem [shape: f32[4,1,32], index: 3, kind: input, shape index: {}]   ;;  %s1372_s4 = inlined_call_operand.vmem [shape: f32[4,1,32], index: 4, kind: input, shape index: {}]   ;;  %s1373_s5 = inlined_call_operand.hbm [shape: f32[4,32,32], index: 5, kind: input, shape index: {}]   ;;  %s1374_s6 = inlined_call_operand.hbm [shape: f32[4,32,32], index: 6, kind: input, shape index: {}]   ;;  %s1375_s7 = inlined_call_operand.vmem [shape: f32[4,1,32], index: 7, kind: input, shape index: {}]   ;;  %s1376_s8 = inlined_call_operand.vmem [shape: f32[1,32], index: 8, kind: input, shape index: {}]   ;;  %s1377_s9 = inlined_call_operand.<no memory space> [shape: f32[1,1], index: 9, kind: input, shape index: {}]   ;;  %s1378_s10 = inlined_call_operand.hbm [shape: f32[1,8,128], index: 10, kind: output, shape index: {}]  }
   0x1   :  { %v15_v0 = vstv %s1377_s9 }
   0x2   :  { %16 = vst [vmem:[#allocation4] sm:$0x1] %v15_v0 }
   0x3   :  { %17 = vsyncpa [#allocation6], 0 }
   0x4   :  { %18 = vsyncpa [#allocation9], 0 }
   0x5   :  { %19 = vsyncpa [#allocation7], 0  ;;  %s1173_s15 = smov [#allocation8]  }
   0x6   :  { %s43_s16 = sshll.u32 %s1173_s15, 4  ;;  %s44_s16 = int_to_ptr.vmem [resolvable:$true] %s43_s16 }
   0x7   :  { %s1095_s17 = scalar_lea.vmem %s44_s16, 2048  ;;  %p1100_p1 = scmp.lt.s32.totalorder %s44_s16, %s44_s16 }
   0x8   :  { %p1096_p0 = scmp.ne.s32.totalorder %s44_s16, %s1095_s17  ;;  %p1101_p2 = scmp.lt.s32.totalorder %s1095_s17, %s1095_s17 }
   0xa   :  { %p1102_p3 = por %p1101_p2, %p1100_p1 }
   0xc   :  { %p1103_p4 = pnand %p1102_p3, %p1096_p0 }
   0xe   :  { %1106 = shalt.err (!%p1103_p4)
}
   0xf   :  { %s1174_s18 = smov 128   ;;  %s1175_s19 = smov 8  }
  0x10   :  { %49 = dma.hbm_to_vmem [thread:$0]  %s1373_s5, 2048, %s44_s16, [#allocation9], %s1174_s18, %s1174_s18, %s1175_s19  }
  0x11   :  { %s1176_s9 = smov [#allocation5]   ;;  %s1177_s23 = smov [#allocation10]  }
  0x12   :  { %s30_s22 = sshll.u32 %s1176_s9, 4  ;;  %s55_s24 = sshll.u32 %s1177_s23, 4  ;;  %s31_s22 = int_to_ptr.vmem [resolvable:$true] %s30_s22  ;;  %s56_s24 = int_to_ptr.vmem [resolvable:$true] %s55_s24 }
  0x13   :  { %s1115_s25 = scalar_lea.vmem %s31_s22, 128  ;;  %p1120_p6 = scmp.lt.s32.totalorder %s31_s22, %s31_s22 }
  0x14   :  { %p1116_p5 = scmp.ne.s32.totalorder %s31_s22, %s1115_s25  ;;  %p1121_p7 = scmp.lt.s32.totalorder %s1115_s25, %s1115_s25 }
  0x16   :  { %p1122_p8 = por %p1121_p7, %p1120_p6 }
  0x18   :  { %p1123_p9 = pnand %p1122_p8, %p1116_p5 }
  0x1a   :  { %1126 = shalt.err (!%p1123_p9)
}
  0x1b   :  { %33 = dma.hbm_to_vmem [thread:$0]  %s1370_s2, 128, %s31_s22, [#allocation6]  }
  0x1c   :  { %s1135_s28 = scalar_lea.vmem %s56_s24, 2048  ;;  %p1140_p11 = scmp.lt.s32.totalorder %s56_s24, %s56_s24 }
  0x1d   :  { %p1136_p10 = scmp.ne.s32.totalorder %s56_s24, %s1135_s28  ;;  %p1141_p12 = scmp.lt.s32.totalorder %s1135_s28, %s1135_s28 }
  0x1f   :  { %p1142_p13 = por %p1141_p12, %p1140_p11 }
  0x21   :  { %p1143_p0 = pnand %p1142_p13, %p1136_p10 }
  0x23   :  { %1146 = shalt.err (!%p1143_p0)
}
  0x24   :  { %61 = dma.hbm_to_vmem [thread:$0]  %s1374_s6, 2048, %s56_s24, [#allocation9], %s1174_s18, %s1174_s18, %s1175_s19  }
  0x25   :  { %1167 = dma.done.wait [#allocation6], 128  }
  0x26   :  { %1168 = vsyncadd [#allocation6], 4294967168 }
  0x27   :  { %1169 = dma.done.wait [#allocation9], 4096  }
  0x28   :  { %1170 = vsyncadd [#allocation9], 4294963200  ;;  %v1178_v1 = vmov 0.0   ;;  %vm1179_vm0 = vmmov 0   ;;  %v1180_v2 = vmov 0   ;;  %v105_v3 = vld [vmem:[#allocation8 + $0x18] sm:$0xff] }
  0x29   :  { %965 = vmatprep.subr.mxu0 %v1178_v1  ;;  %976 = vmatprep.subr.mxu1 %v1178_v1  ;;  %v202_v4 = vld [vmem:[#allocation8 + $0x38] sm:$0xff]  ;;  %v104_v5 = vld [vmem:[#allocation8 + $0x10] sm:$0xff]  ;;  %vm82_vm1 = vcmask 261120   ;;  %v103_v7 = vld [vmem:[#allocation8 + $0x8] sm:$0xff]  ;;  %s1181_s6 = smov 32   ;;  %vm875_vm2 = vcmask 523264  }
  0x2a   :  { %973 = vmatprep.mubr.msk.f32.mxu0 %vm1179_vm0, %v1178_v1  ;;  %984 = vmatprep.mubr.msk.f32.mxu1 %vm1179_vm0, %v1178_v1  ;;  %v201_v6 = vld [vmem:[#allocation8 + $0x30] sm:$0xff]  ;;  %v200_v8 = vld [vmem:[#allocation8 + $0x28] sm:$0xff]  ;;  %v102_v10 = vld [vmem:[#allocation8] sm:$0xff] }
  0x2b   :  { %1063 = vset.pattern.permute.xlu0 %v1180_v2  ;;  %1064 = vset.pattern.permute.xlu1 %v1180_v2  ;;  %v81_v9 = vld [vmem:[%s1369_s1] sm:$0xff]  ;;  %v296_v13 = vld [vmem:[#allocation8 + $0x58] sm:$0xff]  ;;  %v295_v16 = vld [vmem:[#allocation8 + $0x50] sm:$0xff] }
  0x2c   :  { %966 = vmatpush3.msra.mxu0 %v105_v3  ;;  %977 = vmatpush3.msra.mxu1 %v202_v4  ;;  %83 = vst.msk [vmem:[#allocation2] sm:$0xff] %vm82_vm1, %v81_v9  ;;  %v199_v11 = vld [vmem:[#allocation8 + $0x20] sm:$0xff]  ;;  %v390_v14 = vld [vmem:[#allocation8 + $0x78] sm:$0xff]  ;;  %v389_v17 = vld [vmem:[#allocation8 + $0x70] sm:$0xff] }
  0x2d   :  { %967 = vmatprep.subr.mxu0 %v1178_v1  ;;  %978 = vmatprep.subr.mxu1 %v1178_v1  ;;  %v1269_v12 = vld [vmem:[%s1368_s0] sm:$0xff]  ;;  %v84_v22 = vld [vmem:[#allocation5] sm:$0xff]  ;;  %v491_v25 = vld [vmem:[#allocation10 + $0x10] sm:$0xff] }
  0x2e   :  { %968 = vmatpush3.msra.mxu0 %v104_v5  ;;  %979 = vmatpush3.msra.mxu1 %v201_v6  ;;  %v294_v18 = vld [vmem:[#allocation8 + $0x48] sm:$0xff]  ;;  %v293_v20 = vld [vmem:[#allocation8 + $0x40] sm:$0xff]  ;;  %85 = vst.msk [vmem:[#allocation3] sm:$0xff] %vm82_vm1, %v84_v22  ;;  %v492_v23 = vld [vmem:[#allocation10 + $0x18] sm:$0xff] }
  0x2f   :  { %969 = vmatprep.subr.mxu0 %v1178_v1  ;;  %980 = vmatprep.subr.mxu1 %v1178_v1  ;;  %v388_v19 = vld [vmem:[#allocation8 + $0x68] sm:$0xff]  ;;  %v387_v21 = vld [vmem:[#allocation8 + $0x60] sm:$0xff]  ;;  %v577_v24 = vld [vmem:[#allocation10 + $0x38] sm:$0xff] }
  0x30   :  { %970 = vmatpush3.msra.mxu0 %v103_v7  ;;  %981 = vmatpush3.msra.mxu1 %v200_v8  ;;  %v576_v26 = vld [vmem:[#allocation10 + $0x30] sm:$0xff]  ;;  %v490_v27 = vld [vmem:[#allocation10 + $0x8] sm:$0xff]  ;;  %v489_v29 = vld [vmem:[#allocation10] sm:$0xff] }
  0x31   :  { %971 = vmatprep.subr.mxu0 %v1178_v1  ;;  %982 = vmatprep.subr.mxu1 %v1178_v1  ;;  %v575_v28 = vld [vmem:[#allocation10 + $0x28] sm:$0xff]  ;;  %v574_v30 = vld [vmem:[#allocation10 + $0x20] sm:$0xff] }
  0x32   :  { %972 = vmatpush3.msra.mxu0 %v102_v10  ;;  %983 = vmatpush3.msra.mxu1 %v199_v11  ;;  %v894_v32 = vld [vmem:[%s1371_s3] ss:$0 sm:$0xff]  ;;  %v898_v33 = vld [vmem:[%s1371_s3 + $0x1] ss:$0 sm:$0xff]  ;;  %v903_v48 = vld [vmem:[%s1371_s3 + $0x2] ss:$0 sm:$0xff] }
  0x33   :  { %987 = vmatprep.subr.mxu0 %v1178_v1  ;;  %998 = vmatprep.subr.mxu1 %v1178_v1  ;;  %v87_v15 = vld [vmem:[#allocation2] sm:$0xff] }
  0x34   :  { %92 = vperm.xlu0 %1063, %v1269_v12   ;;  %974 = vmatmul.mubr.msk.f32.vlgmr.msra.gmra.mxu0 %vm82_vm1, %v87_v15  ;;  %v896_v37 = vld [vmem:[%s1372_s4] ss:$0 sm:$0xff]  ;;  %v901_v39 = vld [vmem:[%s1372_s4 + $0x1] ss:$0 sm:$0xff]  ;;  %v908_v49 = vld [vmem:[%s1371_s3 + $0x3] ss:$0 sm:$0xff] }
  0x35   :  { %985 = vmatmul.mubr.msk.f32.vlgmr.msra.gmra.mxu1 %vm82_vm1, %v87_v15  ;;  %988 = vmatpush3.msra.mxu0 %v296_v13  ;;  %v906_v52 = vld [vmem:[%s1372_s4 + $0x2] ss:$0 sm:$0xff]  ;;  %v911_v60 = vld [vmem:[%s1372_s4 + $0x3] ss:$0 sm:$0xff]  ;;  %v88_v4 = vld [vmem:[#allocation3] sm:$0xff] }
  0x36   :  { %999 = vmatpush3.msra.mxu1 %v390_v14  ;;  %989 = vmatprep.subr.mxu0 %v1178_v1  ;;  %v741_v22 = vld [vmem:[#allocation10 + $0x68] sm:$0xff] }
  0x37   :  { %1000 = vmatprep.subr.mxu1 %v1178_v1  ;;  %990 = vmatpush3.msra.mxu0 %v295_v16 }
  0x38   :  { %1001 = vmatpush3.msra.mxu1 %v389_v17  ;;  %991 = vmatprep.subr.mxu0 %v1178_v1  ;;  %v660_v17 = vld [vmem:[#allocation10 + $0x58] sm:$0xff] }
  0x39   :  { %1002 = vmatprep.subr.mxu1 %v1178_v1  ;;  %992 = vmatpush3.msra.mxu0 %v294_v18  ;;  %v743_v18 = vld [vmem:[#allocation10 + $0x78] sm:$0xff] }
  0x3a   :  { %1003 = vmatpush3.msra.mxu1 %v388_v19  ;;  %993 = vmatprep.subr.mxu0 %v1178_v1  ;;  %v659_v19 = vld [vmem:[#allocation10 + $0x50] sm:$0xff] }
  0x3b   :  { %1004 = vmatprep.subr.mxu1 %v1178_v1  ;;  %994 = vmatpush3.msra.mxu0 %v293_v20  ;;  %v742_v20 = vld [vmem:[#allocation10 + $0x70] sm:$0xff] }
  0x3c   :  { %995 = vmatprep.mubr.msk.f32.mxu0 %vm1179_vm0, %v1178_v1  ;;  %1005 = vmatpush3.msra.mxu1 %v387_v21  ;;  %v658_v21 = vld [vmem:[#allocation10 + $0x48] sm:$0xff] }
  0x3d   :  { %1006 = vmatprep.mubr.msk.f32.mxu1 %vm1179_vm0, %v1178_v1  ;;  %996 = vmatmul.mubr.msk.f32.vlgmr.msra.gmra.mxu0 %vm82_vm1, %v87_v15 }
  0x3e   :  { %1007 = vmatmul.mubr.msk.f32.vlgmr.msra.gmra.mxu1 %vm82_vm1, %v87_v15  ;;  %1009 = vmatprep.subr.mxu0 %v1178_v1 }
  0x3f   :  { %1020 = vmatprep.subr.mxu1 %v1178_v1  ;;  %1017 = vmatprep.mubr.msk.f32.mxu0 %vm1179_vm0, %v1178_v1 }
  0x40   :  { %1028 = vmatprep.mubr.msk.f32.mxu1 %vm1179_vm0, %v1178_v1  ;;  %1010 = vmatpush3.msra.mxu0 %v492_v23  ;;  %v657_v23 = vld [vmem:[#allocation10 + $0x40] sm:$0xff] }
  0x41   :  { %1021 = vmatpush3.msra.mxu1 %v577_v24  ;;  %1011 = vmatprep.subr.mxu0 %v1178_v1  ;;  %v740_v24 = vld [vmem:[#allocation10 + $0x60] sm:$0xff] }
  0x42   :  { %1022 = vmatprep.subr.mxu1 %v1178_v1  ;;  %1012 = vmatpush3.msra.mxu0 %v491_v25  ;;  %v912_v25 = vld [vmem:[%s1375_s7] ss:$0 sm:$0xff] }
  0x43   :  { %1023 = vmatpush3.msra.mxu1 %v576_v26  ;;  %1013 = vmatprep.subr.mxu0 %v1178_v1  ;;  %v915_v26 = vld [vmem:[%s1375_s7 + $0x1] ss:$0 sm:$0xff] }
  0x44   :  { %1024 = vmatprep.subr.mxu1 %v1178_v1  ;;  %1014 = vmatpush3.msra.mxu0 %v490_v27 }
  0x45   :  { %1025 = vmatpush3.msra.mxu1 %v575_v28  ;;  %1015 = vmatprep.subr.mxu0 %v1178_v1 }
  0x46   :  { %1026 = vmatprep.subr.mxu1 %v1178_v1  ;;  %1016 = vmatpush3.msra.mxu0 %v489_v29 }
  0x47   :  { %1027 = vmatpush3.msra.mxu1 %v574_v30  ;;  %1031 = vmatprep.subr.mxu0 %v1178_v1 }
  0x48   :  { %1042 = vmatprep.subr.mxu1 %v1178_v1 }
  0xaf   :  { %v93_v31 = vpop.permute.xlu0 %92 }
  0xb0   :  { %v101_v34 = vmul.f32 %v894_v32, %v93_v31  ;;  %v197_v35 = vmul.f32 %v898_v33, %v93_v31  ;;  %v291_v50 = vmul.f32 %v903_v48, %v93_v31  ;;  %v385_v55 = vmul.f32 %v908_v49, %v93_v31 }
  0xf4   :  { %v176_v36 = vpop.f32.mrf.mxu0 }
  0xf5   :  { %v269_v38 = vpop.f32.mrf.mxu1  ;;  %v180_v40 = vadd.f32 %v176_v36, %v101_v34  ;;  %v918_v34 = vld [vmem:[%s1375_s7 + $0x2] ss:$0 sm:$0xff] }
  0xf6   :  { %v273_v41 = vadd.f32 %v269_v38, %v197_v35  ;;  %v975_v42 = vpop.f32.mrf.mxu0  ;;  %v921_v38 = vld [vmem:[%s1375_s7 + $0x3] ss:$0 sm:$0xff] }
  0xf7   :  { %v986_v43 = vpop.f32.mrf.mxu1  ;;  %v188_v44 = vadd.f32 %v896_v37, %v180_v40 }
  0xf8   :  { %v282_v45 = vadd.f32 %v901_v39, %v273_v41 }
  0xf9   :  { %v471_v46 = vmul.f32 0.5, %v188_v44 }
  0xfa   :  { %v475_v47 = vmul.f32 0.5, %v282_v45 }
  0xfb   :  { %1065 = vtanh.f32 %v471_v46 }
  0xfc   :  { %1067 = vtanh.f32 %v475_v47 }
  0xfd   :  { %v363_v51 = vpop.f32.mrf.mxu0 }
  0xfe   :  { %v457_v53 = vpop.f32.mrf.mxu1  ;;  %v367_v54 = vadd.f32 %v363_v51, %v291_v50 }
  0xff   :  { %v997_v56 = vpop.f32.mrf.mxu0  ;;  %v461_v59 = vadd.f32 %v457_v53, %v385_v55 }
 0x100   :  { %v1008_v57 = vpop.f32.mrf.mxu1  ;;  %v376_v58 = vadd.f32 %v906_v52, %v367_v54 }
 0x101   :  { %v470_v61 = vadd.f32 %v911_v60, %v461_v59  ;;  %v923_v57 = vld [vmem:[%s1376_s8] ss:$0 sm:$0xff]  ;;  %s1182_s8 = smov [#allocation11]  }
 0x102   :  { %1069 = vtanh.f32 %v376_v58  ;;  %s884_s30 = sshll.u32 %s1182_s8, 4  ;;  %s885_s30 = int_to_ptr.vmem [resolvable:$true] %s884_s30 }
 0x103   :  { %v480_v63 = vmul.f32 0.5, %v470_v61  ;;  %v924_v61 = vld [vmem:[#allocation4] ss:$0 sm:$0xff]  ;;  %s1147_s11 = scalar_lea.vmem %s885_s30, 128  ;;  %p1152_p2 = scmp.lt.s32.totalorder %s885_s30, %s885_s30 }
 0x104   :  { %p1148_p1 = scmp.ne.s32.totalorder %s885_s30, %s1147_s11  ;;  %p1153_p3 = scmp.lt.s32.totalorder %s1147_s11, %s1147_s11 }
 0x105   :  { %1071 = vtanh.f32 %v480_v63 }
 0x106   :  { %p1154_p4 = por %p1153_p3, %p1152_p2 }
 0x108   :  { %v1066_v62 = vpop.eup %1065  ;;  %p1155_p5 = pnand %p1154_p4, %p1148_p1 }
 0x109   :  { %v1068_v0 = vpop.eup %1067  ;;  %v473_v2 = vadd.f32 1.0, %v1066_v62 }
 0x10a   :  { %v477_v3 = vadd.f32 1.0, %v1068_v0 }
 0x10b   :  { %v474_v5 = vmul.f32 0.5, %v473_v2 }
 0x10c   :  { %v478_v6 = vmul.f32 0.5, %v477_v3 }
 0x10e   :  { %v484_v7 = vmul.f32 %v478_v6, %v88_v4 }
 0x10f   :  { %v1070_v8 = vpop.eup %1069 }
 0x110   :  { %v485_v9 = vmul.f32 %v1070_v8, %v474_v5 }
 0x112   :  { %v1327_v10 = vadd.f32 %v485_v9, %v484_v7  ;;  %v1072_v11 = vpop.eup %1071 }
 0x113   :  { %v482_v13 = vadd.f32 1.0, %v1072_v11 }
 0x114   :  { %1073 = vtanh.f32 %v1327_v10 }
 0x115   :  { %v483_v14 = vmul.f32 0.5, %v482_v13 }
 0x121   :  { %v1074_v15 = vpop.eup %1073 }
 0x122   :  { %v488_v16 = vmul.f32 %v1074_v15, %v483_v14 }
 0x124   :  { %1018 = vmatmul.mubr.msk.f32.vlgmr.msra.gmra.mxu0 %vm82_vm1, %v488_v16  ;;  %1029 = vmatmul.mubr.msk.f32.vlgmr.msra.gmra.mxu1 %vm82_vm1, %v488_v16 }
 0x125   :  { %1032 = vmatpush3.msra.mxu0 %v660_v17  ;;  %1043 = vmatpush3.msra.mxu1 %v743_v18 }
 0x126   :  { %1033 = vmatprep.subr.mxu0 %v1178_v1  ;;  %1044 = vmatprep.subr.mxu1 %v1178_v1 }
 0x127   :  { %1034 = vmatpush3.msra.mxu0 %v659_v19  ;;  %1045 = vmatpush3.msra.mxu1 %v742_v20 }
 0x128   :  { %1035 = vmatprep.subr.mxu0 %v1178_v1  ;;  %1046 = vmatprep.subr.mxu1 %v1178_v1 }
 0x129   :  { %1036 = vmatpush3.msra.mxu0 %v658_v21  ;;  %1047 = vmatpush3.msra.mxu1 %v741_v22 }
 0x12a   :  { %1037 = vmatprep.subr.mxu0 %v1178_v1  ;;  %1048 = vmatprep.subr.mxu1 %v1178_v1 }
 0x12b   :  { %1038 = vmatpush3.msra.mxu0 %v657_v23  ;;  %1039 = vmatprep.mubr.msk.f32.mxu0 %vm1179_vm0, %v1178_v1 }
 0x12c   :  { %1049 = vmatpush3.msra.mxu1 %v740_v24  ;;  %1050 = vmatprep.mubr.msk.f32.mxu1 %vm1179_vm0, %v1178_v1 }
 0x12d   :  { %1040 = vmatmul.mubr.msk.f32.vlgmr.msra.gmra.mxu0 %vm82_vm1, %v488_v16  ;;  %1051 = vmatmul.mubr.msk.f32.vlgmr.msra.gmra.mxu1 %vm82_vm1, %v488_v16 }
 0x1e4   :  { %v569_v27 = vpop.f32.mrf.mxu0  ;;  %v652_v28 = vpop.f32.mrf.mxu1 }
 0x1e5   :  { %v570_v29 = vadd.f32 %v912_v25, %v569_v27  ;;  %v653_v30 = vadd.f32 %v915_v26, %v652_v28 }
 0x1e6   :  { %v1019_v31 = vpop.f32.mrf.mxu0  ;;  %v1030_v32 = vpop.f32.mrf.mxu1 }
 0x1e7   :  { %v822_v33 = vmul.f32 0.5, %v570_v29  ;;  %v826_v1 = vmul.f32 0.5, %v653_v30 }
 0x1e9   :  { %1075 = vtanh.f32 %v822_v33 }
 0x1ea   :  { %1077 = vtanh.f32 %v826_v1 }
 0x1ed   :  { %v735_v35 = vpop.f32.mrf.mxu0  ;;  %v818_v36 = vpop.f32.mrf.mxu1 }
 0x1ee   :  { %v736_v37 = vadd.f32 %v918_v34, %v735_v35  ;;  %v819_v41 = vadd.f32 %v921_v38, %v818_v36 }
 0x1ef   :  { %v1041_v39 = vpop.f32.mrf.mxu0  ;;  %v1052_v40 = vpop.f32.mrf.mxu1 }
 0x1f0   :  { %1079 = vtanh.f32 %v736_v37  ;;  %v831_v43 = vmul.f32 0.5, %v819_v41 }
 0x1f2   :  { %1081 = vtanh.f32 %v831_v43 }
 0x1f6   :  { %v1076_v42 = vpop.eup %1075 }
 0x1f7   :  { %v1078_v44 = vpop.eup %1077  ;;  %v824_v45 = vadd.f32 1.0, %v1076_v42 }
 0x1f8   :  { %v828_v46 = vadd.f32 1.0, %v1078_v44 }
 0x1f9   :  { %v825_v47 = vmul.f32 0.5, %v824_v45 }
 0x1fa   :  { %v829_v48 = vmul.f32 0.5, %v828_v46 }
 0x1fc   :  { %v835_v49 = vmul.f32 %v829_v48, %v1327_v10 }
 0x1fd   :  { %v1080_v50 = vpop.eup %1079 }
 0x1fe   :  { %v836_v51 = vmul.f32 %v1080_v50, %v825_v47 }
 0x1ff   :  { %v1082_v53 = vpop.eup %1081 }
 0x200   :  { %v837_v52 = vadd.f32 %v836_v51, %v835_v49  ;;  %v833_v54 = vadd.f32 1.0, %v1082_v53 }
 0x202   :  { %864 = vst.msk [vmem:[#allocation3] sm:$0xff] %vm82_vm1, %v837_v52  ;;  %1083 = vtanh.f32 %v837_v52  ;;  %v834_v55 = vmul.f32 0.5, %v833_v54 }
 0x20f   :  { %v1084_v56 = vpop.eup %1083 }
 0x210   :  { %v839_v58 = vmul.f32 %v1084_v56, %v834_v55 }
 0x212   :  { %v847_v59 = vmul.f32 %v923_v57, %v839_v58  ;;  %863 = vst.msk [vmem:[#allocation2] sm:$0xff] %vm82_vm1, %v839_v58 }
 0x214   :  { %v848_v60 = vsel %vm82_vm1, %v847_v59, 0.0 }
 0x215   :  { %849 = vadd.xlane.f32.xlu0 %v848_v60 }
 0x29e   :  { %v850_v62 = vpop.xlane.xlu0 %849 }
 0x29f   :  { %v858_v63 = vadd.f32 %v924_v61, %v850_v62 }
 0x2a1   :  { %v859_v0 = vadd.f32 %v858_v63, %v1269_v12 }
 0x2a3   :  { %1085 = vtanh.f32 %v859_v0  ;;  %v861_v2 = vmul.f32 0.01, %v859_v0 }
 0x2b0   :  { %v1086_v3 = vpop.eup %1085 }
 0x2b1   :  { %v862_v4 = vadd.f32 %v1086_v3, %v861_v2 }
 0x2b3   :  { %867 = vperm.xlu1 %1064, %v862_v4  }
 0x2b7   :  { %871 = vrot.lane.b32.xlu1 %v837_v52, %s1181_s6 }
 0x32e   :  { %v868_v5 = vpop.permute.xlu1 %867 }
 0x332   :  { %v872_v6 = vpop.permute.xlu1 %871 }
 0x333   :  { %v874_v7 = vsel %vm82_vm1, %v839_v58, %v872_v6 }
 0x334   :  { %v876_v8 = vsel %vm875_vm2, %v874_v7, %v868_v5 }
 0x335   :  { %877 = vst [vmem:[#allocation11] sm:$0xff] %v876_v8 }
 0x336   :  { %1158 = shalt.err (!%p1155_p5)
}
 0x337   :  { %887 = dma.vmem_to_hbm [thread:$0]  %s885_s30, 128, %s1378_s10, [#allocation7]  }
 0x338   :  { %1171 = dma.done.wait [#allocation7], 128  }
 0x339   :  { %1172 = vsyncadd [#allocation7], 4294967168 }
 0x33a   :  { %891 = vsyncpa [#allocation6], 1 }
 0x33b   :  { %892 = vsyncpa [#allocation9], 1 }
 0x33c   :  { %893 = vsyncpa [#allocation7], 1 }

</bundles_post_ra>
